<compile_context>
chip_gen: v5e
topology: v5e:2x2
jax: 0.10.0
libtpu: 0.0.40
codegen_flags: <defaults>
</compile_context>

<pallas_src>
import functools

import jax
import jax.numpy as jnp
from jax.experimental import pallas as pl
from jax.experimental.pallas import tpu as pltpu


def _layer_norm(v, w, b, eps=1e-5):
    # torch.nn.LayerNorm semantics (biased variance, eps inside rsqrt), fp32 math.
    mu = jnp.mean(v, axis=-1, keepdims=True)
    var = jnp.mean((v - mu) ** 2, axis=-1, keepdims=True)
    return (v - mu) * jax.lax.rsqrt(var + eps) * w + b


def residual_attention_block_kernel(
        x_ref,
        wqkv_ref, bqkv_ref, wout_ref, bout_ref,
        ln1_w_ref, ln1_b_ref, ln2_w_ref, ln2_b_ref,
        wfc_ref, bfc_ref, wproj_ref, bproj_ref,
        out_ref,
        ctx_ref,
        *, d_model, n_head, seq_len, batch_tile):
    D = d_model
    L = seq_len
    bt = batch_tile
    mt = bt * L
    hd = D // n_head
    bf16 = jnp.bfloat16
    f32 = jnp.float32

    # (bt, L, D) -> (bt*L, D): bt == 1 or L % 8 == 0 (guarded in the wrapper),
    # so this collapse is a pure layout reinterpretation in fp32.
    x = x_ref[...].reshape(mt, D)                                     # fp32

    # ---- LayerNorm 1 (fp32) ----
    ln1 = _layer_norm(x, ln1_w_ref[...], ln1_b_ref[...])

    # ---- packed qkv in-projection: bf16 operands, fp32 accumulation ----
    # (the 1/sqrt(hd) scale is already folded into the q columns of the weight/bias)
    qkv = jnp.dot(ln1.astype(bf16), wqkv_ref[...],
                  preferred_element_type=f32) + bqkv_ref[...]         # (mt, 3D) fp32
    q = qkv[:, 0 * D:1 * D]
    k = qkv[:, 1 * D:2 * D]
    v = qkv[:, 2 * D:3 * D]

    # ---- attention: batched over the folded batch dim per head; the per-head
    # contexts are written into a (mt, D) bf16 scratch so "concat heads +
    # out_proj" becomes a single full-K matmul on the MXU. ----
    for h in range(n_head):                                           # static unroll
        sl = slice(h * hd, (h + 1) * hd)
        qh = q[:, sl].reshape(bt, L, hd).astype(bf16)
        kh = k[:, sl].reshape(bt, L, hd).astype(bf16)
        vh = v[:, sl].reshape(bt, L, hd).astype(bf16)
        s = jnp.einsum('bqd,bkd->bqk', qh, kh,
                       preferred_element_type=f32)                    # (bt, L, L) fp32
        s = s - jnp.max(s, axis=-1, keepdims=True)
        p = jnp.exp(s)
        p = p * pl.reciprocal(jnp.sum(p, axis=-1, keepdims=True), approx=True)
        ctxh = jnp.einsum('bqk,bkd->bqd', p.astype(bf16), vh,
                          preferred_element_type=f32)                 # (bt, L, hd) fp32
        ctx_ref[:, sl] = ctxh.reshape(mt, hd).astype(bf16)

    attn = jnp.dot(ctx_ref[...], wout_ref[...],
                   preferred_element_type=f32) + bout_ref[...]        # (mt, D) fp32

    # ---- residual 1 (fp32) ----
    x1 = x + attn

    # ---- LayerNorm 2 + MLP (c_fc -> QuickGELU -> c_proj) + residual 2 ----
    ln2 = _layer_norm(x1, ln2_w_ref[...], ln2_b_ref[...])
    h1 = jnp.dot(ln2.astype(bf16), wfc_ref[...],
                 preferred_element_type=f32) + bfc_ref[...]           # (mt, 4D) fp32
    h1 = h1 * jax.nn.sigmoid(1.702 * h1)                              # QuickGELU, fp32
    h2 = jnp.dot(h1.astype(bf16), wproj_ref[...],
                 preferred_element_type=f32) + bproj_ref[...]         # (mt, D) fp32

    out_ref[...] = (x1 + h2).reshape(bt, L, D)


def _vmem_capacity():
    try:
        return int(pltpu.get_tpu_info().vmem_capacity_bytes)
    except Exception:
        return 64 << 20          # conservative fallback (v7x-sized VMEM)


def _weight_bytes(D):
    # bf16 weights (3+1+4+4 = 12 D^2 elems) + fp32 biases / LN params.
    return 24 * D * D + 64 * D


def _step_bytes(bt, L, D):
    """Rough per-grid-step VMEM for activations (fp32 intermediates dominate)."""
    mt = bt * L
    return (4 * (4 * mt * D          # in/out blocks, double-buffered
                 + 16 * mt * D       # fp32 intermediates (x, ln, qkv, residuals, attn)
                 + 2 * mt * 4 * D)   # MLP hidden buffers (fp32)
            + 16 * bt * L * L        # per-head scores/probs (fp32)
            + 2 * mt * D)            # bf16 context scratch


def _choose_batch_tile(N, L, D):
    """Largest VMEM-feasible batch fold; prefers >=2 grid steps once MXU-sized."""
    if L % 8 != 0:
        # TODO(synk): pad L to a multiple of 8 in the wrapper so ragged seq lens
        #             (e.g. CLIP text L=77) can still fold multiple batch elems.
        return 1
    budget = int(0.75 * _vmem_capacity()) - _weight_bytes(D)
    feasible = [1]
    for bt in range(1, N + 1):
        if N % bt != 0:
            continue
        if bt * L > 2048:
            break
        if _step_bytes(bt, L, D) > budget:
            break
        feasible.append(bt)
    # Keep at least 2 grid steps (both v7x TensorCores busy on the "parallel"
    # batch axis) once the fold already fills the MXU M dimension.
    multi = [bt for bt in feasible if N // bt >= 2 and bt * L >= 256]
    return max(multi) if multi else max(feasible)


def _vmem_limit_bytes(bt, L, D):
    cap = _vmem_capacity()
    need = int(1.25 * (_weight_bytes(D) + _step_bytes(bt, L, D))) + (8 << 20)
    return max(32 << 20, min(need, int(0.9 * cap)))


def residual_attention_block(x, params, n_head):
    """x: (L, N, D) float32.  Returns (L, N, D) float32."""
    L, N, D = x.shape
    (wqkv, bqkv, wout, bout, ln1_w, ln1_b, ln2_w, ln2_b,
     wfc, bfc, wproj, bproj) = params

    hd = D // n_head
    scale = 1.0 / (hd ** 0.5)
    f32 = jnp.float32
    bf16 = jnp.bfloat16

    # Pre-transpose weights once host-side into MXU-friendly (K, N) layout, bf16.
    # Fold the 1/sqrt(hd) attention scale into the q third of the packed qkv
    # projection (weight + bias) so the kernel never scales q explicitly.
    wqkv_t = wqkv.T.astype(f32)
    wqkv_t = jnp.concatenate([wqkv_t[:, :D] * scale, wqkv_t[:, D:]], axis=1)
    bqkv_s = jnp.concatenate([bqkv[:, :D] * scale, bqkv[:, D:]], axis=1)

    weight_args = (
        wqkv_t.astype(bf16),   # (D, 3D), q columns pre-scaled
        bqkv_s.astype(f32),
        wout.T.astype(bf16),   # (D, D)
        bout.astype(f32),
        ln1_w.astype(f32), ln1_b.astype(f32),
        ln2_w.astype(f32), ln2_b.astype(f32),
        wfc.T.astype(bf16),    # (D, 4D)
        bfc.astype(f32),
        wproj.T.astype(bf16),  # (4D, D)
        bproj.astype(f32),
    )

    bt = _choose_batch_tile(N, L, D)
    mt = bt * L

    # (L, N, D) -> (N, L, D); XLA fuses this transpose into the surrounding graph.
    x_nld = jnp.transpose(x, (1, 0, 2)).astype(f32)

    kernel = functools.partial(residual_attention_block_kernel,
                               d_model=D, n_head=n_head,
                               seq_len=L, batch_tile=bt)

    # Whole weight arrays resident in VMEM, single-buffered (no per-step pipelining).
    vmem_spec = pl.BlockSpec(memory_space=pltpu.MemorySpace.VMEM)
    in_specs = ([pl.BlockSpec((bt, L, D), lambda b: (b, 0, 0))]
                + [vmem_spec] * len(weight_args))

    out = pl.pallas_call(
        kernel,
        out_shape=jax.ShapeDtypeStruct((N, L, D), jnp.float32),
        grid_spec=pltpu.PrefetchScalarGridSpec(
            num_scalar_prefetch=0,
            grid=(N // bt,),
            in_specs=in_specs,
            out_specs=pl.BlockSpec((bt, L, D), lambda b: (b, 0, 0)),
            scratch_shapes=[pltpu.VMEM((mt, D), jnp.bfloat16)],   # per-head ctx slab
        ),
        compiler_params=pltpu.CompilerParams(
            dimension_semantics=("parallel",),
            vmem_limit_bytes=_vmem_limit_bytes(bt, L, D),
        ),
    )(x_nld, *weight_args)

    return jnp.transpose(out, (1, 0, 2))                      # back to (L, N, D)


def init_params(key, d_model):
    """Deterministic synthetic parameters (shapes match the torch module)."""
    ks = jax.random.split(key, 6)
    s = 0.02
    wqkv = jax.random.normal(ks[0], (3 * d_model, d_model), jnp.float32) * s   # in_proj_weight
    bqkv = jax.random.normal(ks[1], (1, 3 * d_model), jnp.float32) * s         # in_proj_bias
    wout = jax.random.normal(ks[2], (d_model, d_model), jnp.float32) * s       # out_proj.weight
    bout = jnp.zeros((1, d_model), jnp.float32)                                # out_proj.bias
    ln1_w = jnp.ones((1, d_model), jnp.float32)
    ln1_b = jnp.zeros((1, d_model), jnp.float32)
    ln2_w = jnp.ones((1, d_model), jnp.float32)
    ln2_b = jnp.zeros((1, d_model), jnp.float32)
    wfc = jax.random.normal(ks[3], (4 * d_model, d_model), jnp.float32) * s    # mlp.c_fc.weight
    bfc = jax.random.normal(ks[4], (1, 4 * d_model), jnp.float32) * s          # mlp.c_fc.bias
    wproj = jax.random.normal(ks[5], (d_model, 4 * d_model), jnp.float32) * s  # mlp.c_proj.weight
    bproj = jnp.zeros((1, d_model), jnp.float32)                               # mlp.c_proj.bias
    return (wqkv, bqkv, wout, bout, ln1_w, ln1_b, ln2_w, ln2_b, wfc, bfc, wproj, bproj)


def _reference(x, params, n_head):
    """Pure-JAX fp32 reference of the same block (numeric sanity check)."""
    (wqkv, bqkv, wout, bout, ln1_w, ln1_b, ln2_w, ln2_b, wfc, bfc, wproj, bproj) = params
    L, N, D = x.shape
    hd = D // n_head
    scale = 1.0 / (hd ** 0.5)

    def ln(v, w, b):
        mu = jnp.mean(v, axis=-1, keepdims=True)
        var = jnp.mean((v - mu) ** 2, axis=-1, keepdims=True)
        return (v - mu) * jax.lax.rsqrt(var + 1e-5) * w[0] + b[0]

    x1 = ln(x, ln1_w, ln1_b)                                   # (L, N, D)
    qkv = jnp.einsum('lnd,ed->lne', x1, wqkv) + bqkv[0]        # (L, N, 3D)
    q, k, v = jnp.split(qkv, 3, axis=-1)
    q = q.reshape(L, N, n_head, hd) * scale
    k = k.reshape(L, N, n_head, hd)
    v = v.reshape(L, N, n_head, hd)
    s = jnp.einsum('qnhd,knhd->nhqk', q, k)
    p = jax.nn.softmax(s, axis=-1)
    o = jnp.einsum('nhqk,knhd->qnhd', p, v).reshape(L, N, D)
    o = jnp.einsum('lnd,ed->lne', o, wout) + bout[0]
    xa = x + o
    x2 = ln(xa, ln2_w, ln2_b)
    h = jnp.einsum('lnd,ed->lne', x2, wfc) + bfc[0]
    h = h * jax.nn.sigmoid(1.702 * h)
    h = jnp.einsum('lne,de->lnd', h, wproj) + bproj[0]
    return xa + h


if __name__ == "__main__":
    L, N, D, H = 8, 2, 32, 4          # seq, batch, d_model, n_head

    key = jax.random.PRNGKey(0)
    kx, kp = jax.random.split(key)
    x = jax.random.normal(kx, (L, N, D), jnp.float32)
    params = init_params(kp, D)

    out = residual_attention_block(x, params, H)
    out = jax.block_until_ready(out)

    ref = _reference(x, params, H)
    assert out.shape == (L, N, D)
    # bf16 MXU matmuls + approx-reciprocal softmax vs. a pure-fp32 reference.
    assert jnp.allclose(out, ref, atol=2e-2, rtol=2e-2), "mismatch vs pure-JAX reference"

    print("KERNEL_OK")
</pallas_src>

<mosaic_0001>
module attributes {stable_mosaic.version = 11 : i64} {
  func.func @residual_attention_block_kernel(%arg0: i32, %arg1: memref<2x8x32xf32, #tpu.memory_space<vmem>>, %arg2: memref<32x96xbf16, #tpu.memory_space<vmem>>, %arg3: memref<1x96xf32, #tpu.memory_space<vmem>>, %arg4: memref<32x32xbf16, #tpu.memory_space<vmem>>, %arg5: memref<1x32xf32, #tpu.memory_space<vmem>>, %arg6: memref<1x32xf32, #tpu.memory_space<vmem>>, %arg7: memref<1x32xf32, #tpu.memory_space<vmem>>, %arg8: memref<1x32xf32, #tpu.memory_space<vmem>>, %arg9: memref<1x32xf32, #tpu.memory_space<vmem>>, %arg10: memref<32x128xbf16, #tpu.memory_space<vmem>>, %arg11: memref<1x128xf32, #tpu.memory_space<vmem>>, %arg12: memref<128x32xbf16, #tpu.memory_space<vmem>>, %arg13: memref<1x32xf32, #tpu.memory_space<vmem>>, %arg14: memref<2x8x32xf32, #tpu.memory_space<vmem>>, %arg15: memref<16x32xbf16, #tpu.memory_space<vmem>>) attributes {dimension_semantics = [#tpu.dimension_semantics<parallel>], iteration_bounds = array<i64: 1>, scalar_prefetch = 0 : i64, scratch_operands = 1 : i64, tpu.core_type = #tpu.core_type<tc>, window_params = [{transform_indices = @transform_0, window_bounds = array<i64: 2, 8, 32>}, {pipeline_mode = #tpu.pipeline_mode<synchronous>, transform_indices = @transform_1, window_bounds = array<i64: 32, 96>}, {pipeline_mode = #tpu.pipeline_mode<synchronous>, transform_indices = @transform_2, window_bounds = array<i64: 1, 96>}, {pipeline_mode = #tpu.pipeline_mode<synchronous>, transform_indices = @transform_3, window_bounds = array<i64: 32, 32>}, {pipeline_mode = #tpu.pipeline_mode<synchronous>, transform_indices = @transform_4, window_bounds = array<i64: 1, 32>}, {pipeline_mode = #tpu.pipeline_mode<synchronous>, transform_indices = @transform_5, window_bounds = array<i64: 1, 32>}, {pipeline_mode = #tpu.pipeline_mode<synchronous>, transform_indices = @transform_6, window_bounds = array<i64: 1, 32>}, {pipeline_mode = #tpu.pipeline_mode<synchronous>, transform_indices = @transform_7, window_bounds = array<i64: 1, 32>}, {pipeline_mode = #tpu.pipeline_mode<synchronous>, transform_indices = @transform_8, window_bounds = array<i64: 1, 32>}, {pipeline_mode = #tpu.pipeline_mode<synchronous>, transform_indices = @transform_9, window_bounds = array<i64: 32, 128>}, {pipeline_mode = #tpu.pipeline_mode<synchronous>, transform_indices = @transform_10, window_bounds = array<i64: 1, 128>}, {pipeline_mode = #tpu.pipeline_mode<synchronous>, transform_indices = @transform_11, window_bounds = array<i64: 128, 32>}, {pipeline_mode = #tpu.pipeline_mode<synchronous>, transform_indices = @transform_12, window_bounds = array<i64: 1, 32>}, {transform_indices = @transform_13, window_bounds = array<i64: 2, 8, 32>}]} {
    %c0 = arith.constant 0 : index
    %c0_0 = arith.constant 0 : index
    %c0_1 = arith.constant 0 : index
    %0 = vector.load %arg1[%c0, %c0_0, %c0_1] : memref<2x8x32xf32, #tpu.memory_space<vmem>>, vector<2x8x32xf32>
    %1 = vector.shape_cast %0 : vector<2x8x32xf32> to vector<16x32xf32>
    %c0_2 = arith.constant 0 : index
    %c0_3 = arith.constant 0 : index
    %2 = vector.load %arg6[%c0_2, %c0_3] : memref<1x32xf32, #tpu.memory_space<vmem>>, vector<1x32xf32>
    %c0_4 = arith.constant 0 : index
    %c0_5 = arith.constant 0 : index
    %3 = vector.load %arg7[%c0_4, %c0_5] : memref<1x32xf32, #tpu.memory_space<vmem>>, vector<1x32xf32>
    %cst = arith.constant dense<0.000000e+00> : vector<16xf32>
    %4 = vector.multi_reduction <add>, %1, %cst [1] : vector<16x32xf32> to vector<16xf32>
    %5 = vector.shape_cast %4 : vector<16xf32> to vector<16x1xf32>
    %cst_6 = arith.constant 3.200000e+01 : f32
    %6 = vector.broadcast %cst_6 : f32 to vector<16x1xf32>
    %7 = arith.divf %5, %6 : vector<16x1xf32>
    %8 = vector.broadcast %7 : vector<16x1xf32> to vector<16x32xf32>
    %9 = arith.subf %1, %8 : vector<16x32xf32>
    %10 = arith.mulf %9, %9 : vector<16x32xf32>
    %cst_7 = arith.constant dense<0.000000e+00> : vector<16xf32>
    %11 = vector.multi_reduction <add>, %10, %cst_7 [1] : vector<16x32xf32> to vector<16xf32>
    %12 = vector.shape_cast %11 : vector<16xf32> to vector<16x1xf32>
    %cst_8 = arith.constant 3.200000e+01 : f32
    %13 = vector.broadcast %cst_8 : f32 to vector<16x1xf32>
    %14 = arith.divf %12, %13 : vector<16x1xf32>
    %15 = vector.broadcast %7 : vector<16x1xf32> to vector<16x32xf32>
    %16 = arith.subf %1, %15 : vector<16x32xf32>
    %cst_9 = arith.constant 9.99999974E-6 : f32
    %17 = vector.broadcast %cst_9 : f32 to vector<16x1xf32>
    %18 = arith.addf %14, %17 : vector<16x1xf32>
    %19 = math.rsqrt %18 : vector<16x1xf32>
    %20 = vector.broadcast %19 : vector<16x1xf32> to vector<16x32xf32>
    %21 = arith.mulf %16, %20 : vector<16x32xf32>
    %22 = vector.broadcast %2 : vector<1x32xf32> to vector<16x32xf32>
    %23 = arith.mulf %21, %22 : vector<16x32xf32>
    %24 = vector.broadcast %3 : vector<1x32xf32> to vector<16x32xf32>
    %25 = arith.addf %23, %24 : vector<16x32xf32>
    %26 = arith.truncf %25 : vector<16x32xf32> to vector<16x32xbf16>
    %c0_10 = arith.constant 0 : index
    %c0_11 = arith.constant 0 : index
    %27 = vector.load %arg2[%c0_10, %c0_11] : memref<32x96xbf16, #tpu.memory_space<vmem>>, vector<32x96xbf16>
    %cst_12 = arith.constant dense<0.000000e+00> : vector<16x96xf32>
    %28 = tpu.matmul %26, %27, %cst_12 {dimension_numbers = #tpu.dot_dimension_numbers<[1], [0], [0], [1], [0, 0, 1, 1], [], []>} : vector<16x32xbf16>, vector<32x96xbf16>, vector<16x96xf32> -> vector<16x96xf32>
    %c0_13 = arith.constant 0 : index
    %c0_14 = arith.constant 0 : index
    %29 = vector.load %arg3[%c0_13, %c0_14] : memref<1x96xf32, #tpu.memory_space<vmem>>, vector<1x96xf32>
    %30 = vector.broadcast %29 : vector<1x96xf32> to vector<16x96xf32>
    %31 = arith.addf %28, %30 : vector<16x96xf32>
    %32 = vector.extract_strided_slice %31 {offsets = [0, 0], sizes = [16, 32], strides = [1, 1]} : vector<16x96xf32> to vector<16x32xf32>
    %33 = vector.extract_strided_slice %31 {offsets = [0, 32], sizes = [16, 32], strides = [1, 1]} : vector<16x96xf32> to vector<16x32xf32>
    %34 = vector.extract_strided_slice %31 {offsets = [0, 64], sizes = [16, 32], strides = [1, 1]} : vector<16x96xf32> to vector<16x32xf32>
    %35 = vector.extract_strided_slice %32 {offsets = [0, 0], sizes = [16, 8], strides = [1, 1]} : vector<16x32xf32> to vector<16x8xf32>
    %36 = vector.shape_cast %35 : vector<16x8xf32> to vector<2x8x8xf32>
    %37 = arith.truncf %36 : vector<2x8x8xf32> to vector<2x8x8xbf16>
    %38 = vector.extract_strided_slice %33 {offsets = [0, 0], sizes = [16, 8], strides = [1, 1]} : vector<16x32xf32> to vector<16x8xf32>
    %39 = vector.shape_cast %38 : vector<16x8xf32> to vector<2x8x8xf32>
    %40 = arith.truncf %39 : vector<2x8x8xf32> to vector<2x8x8xbf16>
    %41 = vector.extract_strided_slice %34 {offsets = [0, 0], sizes = [16, 8], strides = [1, 1]} : vector<16x32xf32> to vector<16x8xf32>
    %42 = vector.shape_cast %41 : vector<16x8xf32> to vector<2x8x8xf32>
    %43 = arith.truncf %42 : vector<2x8x8xf32> to vector<2x8x8xbf16>
    "tpu.trace_start"() <{level = 10 : i32, message = "bqd,bkd->bqk"}> : () -> ()
    %cst_15 = arith.constant dense<0.000000e+00> : vector<2x8x8xf32>
    %44 = tpu.matmul %37, %40, %cst_15 {dimension_numbers = #tpu.dot_dimension_numbers<[2], [2], [1], [1], [0, 0, 0, 1, 1, 1], [0], [0]>} : vector<2x8x8xbf16>, vector<2x8x8xbf16>, vector<2x8x8xf32> -> vector<2x8x8xf32>
    "tpu.trace_stop"() : () -> ()
    %cst_16 = arith.constant dense<0xFF800000> : vector<2x8xf32>
    %45 = vector.multi_reduction <maximumf>, %44, %cst_16 [2] : vector<2x8x8xf32> to vector<2x8xf32>
    %46 = vector.shape_cast %45 : vector<2x8xf32> to vector<2x8x1xf32>
    %47 = vector.broadcast %46 : vector<2x8x1xf32> to vector<2x8x8xf32>
    %48 = arith.subf %44, %47 : vector<2x8x8xf32>
    %49 = math.exp %48 : vector<2x8x8xf32>
    %cst_17 = arith.constant dense<0.000000e+00> : vector<2x8xf32>
    %50 = vector.multi_reduction <add>, %49, %cst_17 [2] : vector<2x8x8xf32> to vector<2x8xf32>
    %51 = vector.shape_cast %50 : vector<2x8xf32> to vector<2x8x1xf32>
    %52 = tpu.reciprocal %51 {approx = true} : vector<2x8x1xf32> -> vector<2x8x1xf32>
    %53 = vector.broadcast %52 : vector<2x8x1xf32> to vector<2x8x8xf32>
    %54 = arith.mulf %49, %53 : vector<2x8x8xf32>
    %55 = arith.truncf %54 : vector<2x8x8xf32> to vector<2x8x8xbf16>
    "tpu.trace_start"() <{level = 10 : i32, message = "bqk,bkd->bqd"}> : () -> ()
    %cst_18 = arith.constant dense<0.000000e+00> : vector<2x8x8xf32>
    %56 = tpu.matmul %55, %43, %cst_18 {dimension_numbers = #tpu.dot_dimension_numbers<[2], [1], [1], [2], [0, 0, 0, 1, 1, 2], [0], [0]>} : vector<2x8x8xbf16>, vector<2x8x8xbf16>, vector<2x8x8xf32> -> vector<2x8x8xf32>
    "tpu.trace_stop"() : () -> ()
    %57 = vector.shape_cast %56 : vector<2x8x8xf32> to vector<16x8xf32>
    %58 = arith.truncf %57 : vector<16x8xf32> to vector<16x8xbf16>
    %c0_19 = arith.constant 0 : index
    %c0_20 = arith.constant 0 : index
    %59 = vector.load %arg15[%c0_19, %c0_20] : memref<16x32xbf16, #tpu.memory_space<vmem>>, vector<16x8xbf16>
    tpu.vector_store %arg15[%c0_19, %c0_20], %58 {strides = array<i32>} : memref<16x32xbf16, #tpu.memory_space<vmem>>, vector<16x8xbf16>,
    %60 = vector.extract_strided_slice %32 {offsets = [0, 8], sizes = [16, 8], strides = [1, 1]} : vector<16x32xf32> to vector<16x8xf32>
    %61 = vector.shape_cast %60 : vector<16x8xf32> to vector<2x8x8xf32>
    %62 = arith.truncf %61 : vector<2x8x8xf32> to vector<2x8x8xbf16>
    %63 = vector.extract_strided_slice %33 {offsets = [0, 8], sizes = [16, 8], strides = [1, 1]} : vector<16x32xf32> to vector<16x8xf32>
    %64 = vector.shape_cast %63 : vector<16x8xf32> to vector<2x8x8xf32>
    %65 = arith.truncf %64 : vector<2x8x8xf32> to vector<2x8x8xbf16>
    %66 = vector.extract_strided_slice %34 {offsets = [0, 8], sizes = [16, 8], strides = [1, 1]} : vector<16x32xf32> to vector<16x8xf32>
    %67 = vector.shape_cast %66 : vector<16x8xf32> to vector<2x8x8xf32>
    %68 = arith.truncf %67 : vector<2x8x8xf32> to vector<2x8x8xbf16>
    "tpu.trace_start"() <{level = 10 : i32, message = "bqd,bkd->bqk"}> : () -> ()
    %cst_21 = arith.constant dense<0.000000e+00> : vector<2x8x8xf32>
    %69 = tpu.matmul %62, %65, %cst_21 {dimension_numbers = #tpu.dot_dimension_numbers<[2], [2], [1], [1], [0, 0, 0, 1, 1, 1], [0], [0]>} : vector<2x8x8xbf16>, vector<2x8x8xbf16>, vector<2x8x8xf32> -> vector<2x8x8xf32>
    "tpu.trace_stop"() : () -> ()
    %cst_22 = arith.constant dense<0xFF800000> : vector<2x8xf32>
    %70 = vector.multi_reduction <maximumf>, %69, %cst_22 [2] : vector<2x8x8xf32> to vector<2x8xf32>
    %71 = vector.shape_cast %70 : vector<2x8xf32> to vector<2x8x1xf32>
    %72 = vector.broadcast %71 : vector<2x8x1xf32> to vector<2x8x8xf32>
    %73 = arith.subf %69, %72 : vector<2x8x8xf32>
    %74 = math.exp %73 : vector<2x8x8xf32>
    %cst_23 = arith.constant dense<0.000000e+00> : vector<2x8xf32>
    %75 = vector.multi_reduction <add>, %74, %cst_23 [2] : vector<2x8x8xf32> to vector<2x8xf32>
    %76 = vector.shape_cast %75 : vector<2x8xf32> to vector<2x8x1xf32>
    %77 = tpu.reciprocal %76 {approx = true} : vector<2x8x1xf32> -> vector<2x8x1xf32>
    %78 = vector.broadcast %77 : vector<2x8x1xf32> to vector<2x8x8xf32>
    %79 = arith.mulf %74, %78 : vector<2x8x8xf32>
    %80 = arith.truncf %79 : vector<2x8x8xf32> to vector<2x8x8xbf16>
    "tpu.trace_start"() <{level = 10 : i32, message = "bqk,bkd->bqd"}> : () -> ()
    %cst_24 = arith.constant dense<0.000000e+00> : vector<2x8x8xf32>
    %81 = tpu.matmul %80, %68, %cst_24 {dimension_numbers = #tpu.dot_dimension_numbers<[2], [1], [1], [2], [0, 0, 0, 1, 1, 2], [0], [0]>} : vector<2x8x8xbf16>, vector<2x8x8xbf16>, vector<2x8x8xf32> -> vector<2x8x8xf32>
    "tpu.trace_stop"() : () -> ()
    %82 = vector.shape_cast %81 : vector<2x8x8xf32> to vector<16x8xf32>
    %83 = arith.truncf %82 : vector<16x8xf32> to vector<16x8xbf16>
    %c0_25 = arith.constant 0 : index
    %c8 = arith.constant 8 : index
    %84 = vector.load %arg15[%c0_25, %c8] : memref<16x32xbf16, #tpu.memory_space<vmem>>, vector<16x8xbf16>
    tpu.vector_store %arg15[%c0_25, %c8], %83 {strides = array<i32>} : memref<16x32xbf16, #tpu.memory_space<vmem>>, vector<16x8xbf16>,
    %85 = vector.extract_strided_slice %32 {offsets = [0, 16], sizes = [16, 8], strides = [1, 1]} : vector<16x32xf32> to vector<16x8xf32>
    %86 = vector.shape_cast %85 : vector<16x8xf32> to vector<2x8x8xf32>
    %87 = arith.truncf %86 : vector<2x8x8xf32> to vector<2x8x8xbf16>
    %88 = vector.extract_strided_slice %33 {offsets = [0, 16], sizes = [16, 8], strides = [1, 1]} : vector<16x32xf32> to vector<16x8xf32>
    %89 = vector.shape_cast %88 : vector<16x8xf32> to vector<2x8x8xf32>
    %90 = arith.truncf %89 : vector<2x8x8xf32> to vector<2x8x8xbf16>
    %91 = vector.extract_strided_slice %34 {offsets = [0, 16], sizes = [16, 8], strides = [1, 1]} : vector<16x32xf32> to vector<16x8xf32>
    %92 = vector.shape_cast %91 : vector<16x8xf32> to vector<2x8x8xf32>
    %93 = arith.truncf %92 : vector<2x8x8xf32> to vector<2x8x8xbf16>
    "tpu.trace_start"() <{level = 10 : i32, message = "bqd,bkd->bqk"}> : () -> ()
    %cst_26 = arith.constant dense<0.000000e+00> : vector<2x8x8xf32>
    %94 = tpu.matmul %87, %90, %cst_26 {dimension_numbers = #tpu.dot_dimension_numbers<[2], [2], [1], [1], [0, 0, 0, 1, 1, 1], [0], [0]>} : vector<2x8x8xbf16>, vector<2x8x8xbf16>, vector<2x8x8xf32> -> vector<2x8x8xf32>
    "tpu.trace_stop"() : () -> ()
    %cst_27 = arith.constant dense<0xFF800000> : vector<2x8xf32>
    %95 = vector.multi_reduction <maximumf>, %94, %cst_27 [2] : vector<2x8x8xf32> to vector<2x8xf32>
    %96 = vector.shape_cast %95 : vector<2x8xf32> to vector<2x8x1xf32>
    %97 = vector.broadcast %96 : vector<2x8x1xf32> to vector<2x8x8xf32>
    %98 = arith.subf %94, %97 : vector<2x8x8xf32>
    %99 = math.exp %98 : vector<2x8x8xf32>
    %cst_28 = arith.constant dense<0.000000e+00> : vector<2x8xf32>
    %100 = vector.multi_reduction <add>, %99, %cst_28 [2] : vector<2x8x8xf32> to vector<2x8xf32>
    %101 = vector.shape_cast %100 : vector<2x8xf32> to vector<2x8x1xf32>
    %102 = tpu.reciprocal %101 {approx = true} : vector<2x8x1xf32> -> vector<2x8x1xf32>
    %103 = vector.broadcast %102 : vector<2x8x1xf32> to vector<2x8x8xf32>
    %104 = arith.mulf %99, %103 : vector<2x8x8xf32>
    %105 = arith.truncf %104 : vector<2x8x8xf32> to vector<2x8x8xbf16>
    "tpu.trace_start"() <{level = 10 : i32, message = "bqk,bkd->bqd"}> : () -> ()
    %cst_29 = arith.constant dense<0.000000e+00> : vector<2x8x8xf32>
    %106 = tpu.matmul %105, %93, %cst_29 {dimension_numbers = #tpu.dot_dimension_numbers<[2], [1], [1], [2], [0, 0, 0, 1, 1, 2], [0], [0]>} : vector<2x8x8xbf16>, vector<2x8x8xbf16>, vector<2x8x8xf32> -> vector<2x8x8xf32>
    "tpu.trace_stop"() : () -> ()
    %107 = vector.shape_cast %106 : vector<2x8x8xf32> to vector<16x8xf32>
    %108 = arith.truncf %107 : vector<16x8xf32> to vector<16x8xbf16>
    %c0_30 = arith.constant 0 : index
    %c16 = arith.constant 16 : index
    %109 = vector.load %arg15[%c0_30, %c16] : memref<16x32xbf16, #tpu.memory_space<vmem>>, vector<16x8xbf16>
    tpu.vector_store %arg15[%c0_30, %c16], %108 {strides = array<i32>} : memref<16x32xbf16, #tpu.memory_space<vmem>>, vector<16x8xbf16>,
    %110 = vector.extract_strided_slice %32 {offsets = [0, 24], sizes = [16, 8], strides = [1, 1]} : vector<16x32xf32> to vector<16x8xf32>
    %111 = vector.shape_cast %110 : vector<16x8xf32> to vector<2x8x8xf32>
    %112 = arith.truncf %111 : vector<2x8x8xf32> to vector<2x8x8xbf16>
    %113 = vector.extract_strided_slice %33 {offsets = [0, 24], sizes = [16, 8], strides = [1, 1]} : vector<16x32xf32> to vector<16x8xf32>
    %114 = vector.shape_cast %113 : vector<16x8xf32> to vector<2x8x8xf32>
    %115 = arith.truncf %114 : vector<2x8x8xf32> to vector<2x8x8xbf16>
    %116 = vector.extract_strided_slice %34 {offsets = [0, 24], sizes = [16, 8], strides = [1, 1]} : vector<16x32xf32> to vector<16x8xf32>
    %117 = vector.shape_cast %116 : vector<16x8xf32> to vector<2x8x8xf32>
    %118 = arith.truncf %117 : vector<2x8x8xf32> to vector<2x8x8xbf16>
    "tpu.trace_start"() <{level = 10 : i32, message = "bqd,bkd->bqk"}> : () -> ()
    %cst_31 = arith.constant dense<0.000000e+00> : vector<2x8x8xf32>
    %119 = tpu.matmul %112, %115, %cst_31 {dimension_numbers = #tpu.dot_dimension_numbers<[2], [2], [1], [1], [0, 0, 0, 1, 1, 1], [0], [0]>} : vector<2x8x8xbf16>, vector<2x8x8xbf16>, vector<2x8x8xf32> -> vector<2x8x8xf32>
    "tpu.trace_stop"() : () -> ()
    %cst_32 = arith.constant dense<0xFF800000> : vector<2x8xf32>
    %120 = vector.multi_reduction <maximumf>, %119, %cst_32 [2] : vector<2x8x8xf32> to vector<2x8xf32>
    %121 = vector.shape_cast %120 : vector<2x8xf32> to vector<2x8x1xf32>
    %122 = vector.broadcast %121 : vector<2x8x1xf32> to vector<2x8x8xf32>
    %123 = arith.subf %119, %122 : vector<2x8x8xf32>
    %124 = math.exp %123 : vector<2x8x8xf32>
    %cst_33 = arith.constant dense<0.000000e+00> : vector<2x8xf32>
    %125 = vector.multi_reduction <add>, %124, %cst_33 [2] : vector<2x8x8xf32> to vector<2x8xf32>
    %126 = vector.shape_cast %125 : vector<2x8xf32> to vector<2x8x1xf32>
    %127 = tpu.reciprocal %126 {approx = true} : vector<2x8x1xf32> -> vector<2x8x1xf32>
    %128 = vector.broadcast %127 : vector<2x8x1xf32> to vector<2x8x8xf32>
    %129 = arith.mulf %124, %128 : vector<2x8x8xf32>
    %130 = arith.truncf %129 : vector<2x8x8xf32> to vector<2x8x8xbf16>
    "tpu.trace_start"() <{level = 10 : i32, message = "bqk,bkd->bqd"}> : () -> ()
    %cst_34 = arith.constant dense<0.000000e+00> : vector<2x8x8xf32>
    %131 = tpu.matmul %130, %118, %cst_34 {dimension_numbers = #tpu.dot_dimension_numbers<[2], [1], [1], [2], [0, 0, 0, 1, 1, 2], [0], [0]>} : vector<2x8x8xbf16>, vector<2x8x8xbf16>, vector<2x8x8xf32> -> vector<2x8x8xf32>
    "tpu.trace_stop"() : () -> ()
    %132 = vector.shape_cast %131 : vector<2x8x8xf32> to vector<16x8xf32>
    %133 = arith.truncf %132 : vector<16x8xf32> to vector<16x8xbf16>
    %c0_35 = arith.constant 0 : index
    %c24 = arith.constant 24 : index
    %134 = vector.load %arg15[%c0_35, %c24] : memref<16x32xbf16, #tpu.memory_space<vmem>>, vector<16x8xbf16>
    tpu.vector_store %arg15[%c0_35, %c24], %133 {strides = array<i32>} : memref<16x32xbf16, #tpu.memory_space<vmem>>, vector<16x8xbf16>,
    %c0_36 = arith.constant 0 : index
    %c0_37 = arith.constant 0 : index
    %135 = vector.load %arg15[%c0_36, %c0_37] : memref<16x32xbf16, #tpu.memory_space<vmem>>, vector<16x32xbf16>
    %c0_38 = arith.constant 0 : index
    %c0_39 = arith.constant 0 : index
    %136 = vector.load %arg4[%c0_38, %c0_39] : memref<32x32xbf16, #tpu.memory_space<vmem>>, vector<32x32xbf16>
    %cst_40 = arith.constant dense<0.000000e+00> : vector<16x32xf32>
    %137 = tpu.matmul %135, %136, %cst_40 {dimension_numbers = #tpu.dot_dimension_numbers<[1], [0], [0], [1], [0, 0, 1, 1], [], []>} : vector<16x32xbf16>, vector<32x32xbf16>, vector<16x32xf32> -> vector<16x32xf32>
    %c0_41 = arith.constant 0 : index
    %c0_42 = arith.constant 0 : index
    %138 = vector.load %arg5[%c0_41, %c0_42] : memref<1x32xf32, #tpu.memory_space<vmem>>, vector<1x32xf32>
    %139 = vector.broadcast %138 : vector<1x32xf32> to vector<16x32xf32>
    %140 = arith.addf %137, %139 : vector<16x32xf32>
    %141 = arith.addf %1, %140 : vector<16x32xf32>
    %c0_43 = arith.constant 0 : index
    %c0_44 = arith.constant 0 : index
    %142 = vector.load %arg8[%c0_43, %c0_44] : memref<1x32xf32, #tpu.memory_space<vmem>>, vector<1x32xf32>
    %c0_45 = arith.constant 0 : index
    %c0_46 = arith.constant 0 : index
    %143 = vector.load %arg9[%c0_45, %c0_46] : memref<1x32xf32, #tpu.memory_space<vmem>>, vector<1x32xf32>
    %cst_47 = arith.constant dense<0.000000e+00> : vector<16xf32>
    %144 = vector.multi_reduction <add>, %141, %cst_47 [1] : vector<16x32xf32> to vector<16xf32>
    %145 = vector.shape_cast %144 : vector<16xf32> to vector<16x1xf32>
    %cst_48 = arith.constant 3.200000e+01 : f32
    %146 = vector.broadcast %cst_48 : f32 to vector<16x1xf32>
    %147 = arith.divf %145, %146 : vector<16x1xf32>
    %148 = vector.broadcast %147 : vector<16x1xf32> to vector<16x32xf32>
    %149 = arith.subf %141, %148 : vector<16x32xf32>
    %150 = arith.mulf %149, %149 : vector<16x32xf32>
    %cst_49 = arith.constant dense<0.000000e+00> : vector<16xf32>
    %151 = vector.multi_reduction <add>, %150, %cst_49 [1] : vector<16x32xf32> to vector<16xf32>
    %152 = vector.shape_cast %151 : vector<16xf32> to vector<16x1xf32>
    %cst_50 = arith.constant 3.200000e+01 : f32
    %153 = vector.broadcast %cst_50 : f32 to vector<16x1xf32>
    %154 = arith.divf %152, %153 : vector<16x1xf32>
    %155 = vector.broadcast %147 : vector<16x1xf32> to vector<16x32xf32>
    %156 = arith.subf %141, %155 : vector<16x32xf32>
    %cst_51 = arith.constant 9.99999974E-6 : f32
    %157 = vector.broadcast %cst_51 : f32 to vector<16x1xf32>
    %158 = arith.addf %154, %157 : vector<16x1xf32>
    %159 = math.rsqrt %158 : vector<16x1xf32>
    %160 = vector.broadcast %159 : vector<16x1xf32> to vector<16x32xf32>
    %161 = arith.mulf %156, %160 : vector<16x32xf32>
    %162 = vector.broadcast %142 : vector<1x32xf32> to vector<16x32xf32>
    %163 = arith.mulf %161, %162 : vector<16x32xf32>
    %164 = vector.broadcast %143 : vector<1x32xf32> to vector<16x32xf32>
    %165 = arith.addf %163, %164 : vector<16x32xf32>
    %166 = arith.truncf %165 : vector<16x32xf32> to vector<16x32xbf16>
    %c0_52 = arith.constant 0 : index
    %c0_53 = arith.constant 0 : index
    %167 = vector.load %arg10[%c0_52, %c0_53] : memref<32x128xbf16, #tpu.memory_space<vmem>>, vector<32x128xbf16>
    %cst_54 = arith.constant dense<0.000000e+00> : vector<16x128xf32>
    %168 = tpu.matmul %166, %167, %cst_54 {dimension_numbers = #tpu.dot_dimension_numbers<[1], [0], [0], [1], [0, 0, 1, 1], [], []>} : vector<16x32xbf16>, vector<32x128xbf16>, vector<16x128xf32> -> vector<16x128xf32>
    %c0_55 = arith.constant 0 : index
    %c0_56 = arith.constant 0 : index
    %169 = vector.load %arg11[%c0_55, %c0_56] : memref<1x128xf32, #tpu.memory_space<vmem>>, vector<1x128xf32>
    %170 = vector.broadcast %169 : vector<1x128xf32> to vector<16x128xf32>
    %171 = arith.addf %168, %170 : vector<16x128xf32>
    %cst_57 = arith.constant 1.702000e+00 : f32
    %172 = vector.broadcast %cst_57 : f32 to vector<16x128xf32>
    %173 = arith.mulf %172, %171 : vector<16x128xf32>
    %174 = arith.negf %173 : vector<16x128xf32>
    %175 = math.exp %174 : vector<16x128xf32>
    %cst_58 = arith.constant 1.000000e+00 : f32
    %176 = vector.broadcast %cst_58 : f32 to vector<16x128xf32>
    %177 = arith.addf %176, %175 : vector<16x128xf32>
    %178 = arith.divf %176, %177 : vector<16x128xf32>
    %179 = arith.mulf %171, %178 : vector<16x128xf32>
    %180 = arith.truncf %179 : vector<16x128xf32> to vector<16x128xbf16>
    %c0_59 = arith.constant 0 : index
    %c0_60 = arith.constant 0 : index
    %181 = vector.load %arg12[%c0_59, %c0_60] : memref<128x32xbf16, #tpu.memory_space<vmem>>, vector<128x32xbf16>
    %cst_61 = arith.constant dense<0.000000e+00> : vector<16x32xf32>
    %182 = tpu.matmul %180, %181, %cst_61 {dimension_numbers = #tpu.dot_dimension_numbers<[1], [0], [0], [1], [0, 0, 1, 1], [], []>} : vector<16x128xbf16>, vector<128x32xbf16>, vector<16x32xf32> -> vector<16x32xf32>
    %c0_62 = arith.constant 0 : index
    %c0_63 = arith.constant 0 : index
    %183 = vector.load %arg13[%c0_62, %c0_63] : memref<1x32xf32, #tpu.memory_space<vmem>>, vector<1x32xf32>
    %184 = vector.broadcast %183 : vector<1x32xf32> to vector<16x32xf32>
    %185 = arith.addf %182, %184 : vector<16x32xf32>
    %186 = arith.addf %141, %185 : vector<16x32xf32>
    %187 = vector.shape_cast %186 : vector<16x32xf32> to vector<2x8x32xf32>
    %c0_64 = arith.constant 0 : index
    %c0_65 = arith.constant 0 : index
    %c0_66 = arith.constant 0 : index
    %188 = vector.load %arg14[%c0_64, %c0_65, %c0_66] : memref<2x8x32xf32, #tpu.memory_space<vmem>>, vector<2x8x32xf32>
    tpu.vector_store %arg14[%c0_64, %c0_65, %c0_66], %187 {strides = array<i32>} : memref<2x8x32xf32, #tpu.memory_space<vmem>>, vector<2x8x32xf32>,
    return
  }
  func.func @transform_0(%arg0: i32) -> (i32, i32, i32) {
    %c0_i32 = arith.constant 0 : i32
    %c0_i32_0 = arith.constant 0 : i32
    %c0_i32_1 = arith.constant 0 : i32
    return %arg0, %c0_i32, %c0_i32_0 : i32, i32, i32
  }
  func.func @transform_1(%arg0: i32) -> (i32, i32) {
    %c0_i32 = arith.constant 0 : i32
    %c0_i32_0 = arith.constant 0 : i32
    %c0_i32_1 = arith.constant 0 : i32
    return %c0_i32, %c0_i32_0 : i32, i32
  }
  func.func @transform_2(%arg0: i32) -> (i32, i32) {
    %c0_i32 = arith.constant 0 : i32
    %c0_i32_0 = arith.constant 0 : i32
    %c0_i32_1 = arith.constant 0 : i32
    return %c0_i32, %c0_i32_0 : i32, i32
  }
  func.func @transform_3(%arg0: i32) -> (i32, i32) {
    %c0_i32 = arith.constant 0 : i32
    %c0_i32_0 = arith.constant 0 : i32
    %c0_i32_1 = arith.constant 0 : i32
    return %c0_i32, %c0_i32_0 : i32, i32
  }
  func.func @transform_4(%arg0: i32) -> (i32, i32) {
    %c0_i32 = arith.constant 0 : i32
    %c0_i32_0 = arith.constant 0 : i32
    %c0_i32_1 = arith.constant 0 : i32
    return %c0_i32, %c0_i32_0 : i32, i32
  }
  func.func @transform_5(%arg0: i32) -> (i32, i32) {
    %c0_i32 = arith.constant 0 : i32
    %c0_i32_0 = arith.constant 0 : i32
    %c0_i32_1 = arith.constant 0 : i32
    return %c0_i32, %c0_i32_0 : i32, i32
  }
  func.func @transform_6(%arg0: i32) -> (i32, i32) {
    %c0_i32 = arith.constant 0 : i32
    %c0_i32_0 = arith.constant 0 : i32
    %c0_i32_1 = arith.constant 0 : i32
    return %c0_i32, %c0_i32_0 : i32, i32
  }
  func.func @transform_7(%arg0: i32) -> (i32, i32) {
    %c0_i32 = arith.constant 0 : i32
    %c0_i32_0 = arith.constant 0 : i32
    %c0_i32_1 = arith.constant 0 : i32
    return %c0_i32, %c0_i32_0 : i32, i32
  }
  func.func @transform_8(%arg0: i32) -> (i32, i32) {
    %c0_i32 = arith.constant 0 : i32
    %c0_i32_0 = arith.constant 0 : i32
    %c0_i32_1 = arith.constant 0 : i32
    return %c0_i32, %c0_i32_0 : i32, i32
  }
  func.func @transform_9(%arg0: i32) -> (i32, i32) {
    %c0_i32 = arith.constant 0 : i32
    %c0_i32_0 = arith.constant 0 : i32
    %c0_i32_1 = arith.constant 0 : i32
    return %c0_i32, %c0_i32_0 : i32, i32
  }
  func.func @transform_10(%arg0: i32) -> (i32, i32) {
    %c0_i32 = arith.constant 0 : i32
    %c0_i32_0 = arith.constant 0 : i32
    %c0_i32_1 = arith.constant 0 : i32
    return %c0_i32, %c0_i32_0 : i32, i32
  }
  func.func @transform_11(%arg0: i32) -> (i32, i32) {
    %c0_i32 = arith.constant 0 : i32
    %c0_i32_0 = arith.constant 0 : i32
    %c0_i32_1 = arith.constant 0 : i32
    return %c0_i32, %c0_i32_0 : i32, i32
  }
  func.func @transform_12(%arg0: i32) -> (i32, i32) {
    %c0_i32 = arith.constant 0 : i32
    %c0_i32_0 = arith.constant 0 : i32
    %c0_i32_1 = arith.constant 0 : i32
    return %c0_i32, %c0_i32_0 : i32, i32
  }
  func.func @transform_13(%arg0: i32) -> (i32, i32, i32) {
    %c0_i32 = arith.constant 0 : i32
    %c0_i32_0 = arith.constant 0 : i32
    %c0_i32_1 = arith.constant 0 : i32
    return %arg0, %c0_i32, %c0_i32_0 : i32, i32, i32
  }
}

</mosaic_0001>

<bundles_post_ra>
// kernel: tpu_custom_call.1
= control target key start
LH: loop header
LB: loop body
LE: loop exit
PB: predicated region body
PF: predicated region fallthrough
CT: control target
= control target key end

     0   :  { %vm50_vm0 = vcmask 261120   ;;  %s1448_s0 = inlined_call_operand.vmem [shape: f32[2,8,32], index: 0, kind: input, shape index: {}]   ;;  %s1449_s1 = inlined_call_operand.vmem [shape: bf16[32,96], index: 1, kind: input, shape index: {}]   ;;  %s1450_s2 = inlined_call_operand.vmem [shape: f32[1,96], index: 2, kind: input, shape index: {}]   ;;  %s1451_s3 = inlined_call_operand.vmem [shape: bf16[32,32], index: 3, kind: input, shape index: {}]   ;;  %s1452_s4 = inlined_call_operand.vmem [shape: f32[1,32], index: 4, kind: input, shape index: {}]   ;;  %s1453_s5 = inlined_call_operand.vmem [shape: f32[1,32], index: 5, kind: input, shape index: {}]   ;;  %s1454_s6 = inlined_call_operand.vmem [shape: f32[1,32], index: 6, kind: input, shape index: {}]   ;;  %s1455_s7 = inlined_call_operand.vmem [shape: f32[1,32], index: 7, kind: input, shape index: {}]   ;;  %s1456_s8 = inlined_call_operand.vmem [shape: f32[1,32], index: 8, kind: input, shape index: {}]   ;;  %s1457_s9 = inlined_call_operand.vmem [shape: bf16[32,128], index: 9, kind: input, shape index: {}]   ;;  %s1458_s10 = inlined_call_operand.vmem [shape: f32[1,128], index: 10, kind: input, shape index: {}]   ;;  %s1459_s11 = inlined_call_operand.vmem [shape: bf16[128,32], index: 11, kind: input, shape index: {}]   ;;  %s1460_s12 = inlined_call_operand.vmem [shape: f32[1,32], index: 12, kind: input, shape index: {}]   ;;  %s1461_s13 = inlined_call_operand.hbm [shape: f32[2,8,32], index: 13, kind: output, shape index: {}]  }
   0x1   :  { %v1222_v0 = vld [vmem:[%s1448_s0] sm:$0xff] }
   0x2   :  { %v51_v1 = vsel %vm50_vm0, %v1222_v0, 0.0 }
   0x3   :  { %52 = vadd.xlane.f32.xlu0 %v51_v1 }
   0x4   :  { %18 = vsyncpa [#allocation4], 0  ;;  %v1229_v2 = vld [vmem:[%s1448_s0 + $0x8] sm:$0xff]  ;;  %v1132_v4 = vmov 32.0   ;;  %v1016_v23 = vld [vmem:[%s1449_s1] sm:$0xff]  ;;  %s1135_s20 = smov 96  }
   0x5   :  { %v54_v3 = vsel %vm50_vm0, %v1229_v2, 0.0  ;;  %1056 = vrcp.f32 %v1132_v4  ;;  %v1017_v21 = vld [vmem:[%s1449_s1 + $0x8] sm:$0xff]  ;;  %v1048_v42 = vld [vmem:[%s1453_s5] ss:$0 sm:$0xff]  ;;  %s1133_s5 = smov 120   ;;  %s1137_s21 = smov 80  }
   0x6   :  { %142 = vmatpush.bf16.msra.mxu0 %v1017_v21  ;;  %v1049_v47 = vld [vmem:[%s1454_s6] ss:$0 sm:$0xff]  ;;  %s1134_s6 = smov 88   ;;  %s1138_s22 = smov 104   ;;  %vm157_vm8 = vcmask 64512   ;;  %vm230_vm9 = vcmask 1043456  }
   0x7   :  { %v1050_v52 = vld [vmem:[%s1450_s2] ss:$0 sm:$0xff]  ;;  %s1136_s2 = smov 112   ;;  %s1139_s23 = smov 72   ;;  %vm270_vm10 = vcmask 60416   ;;  %vm395_vm11 = vcmask 126016  }
   0x8   :  { %s1140_s24 = smov 64   ;;  %s1141_s25 = smov 48   ;;  %vm520_vm12 = vcmask 191616   ;;  %vm645_vm13 = vcmask 257216  }
   0x9   :  { %s1142_s26 = smov 56   ;;  %s1143_s27 = smov 40  }
   0xa   :  { %143 = vmatpush.bf16.msra.mxu0 %v1016_v23  ;;  %s1144_s28 = smov 16   ;;  %s1145_s0 = smov 8  }
   0xb   :  { %55 = vadd.xlane.f32.xlu0 %v54_v3  ;;  %v1057_v5 = vpop.eup %1056  ;;  %s1146_s29 = smov 24  }
   0xc   :  { %v58_v6 = vmul.f32 32.0, %v1057_v5  ;;  %vm62_vm1 = vweird.f32 %v1057_v5 }
   0xe   :  { %v59_v7 = vsub.f32 1.0, %v58_v6 }
  0x10   :  { %v60_v8 = vmul.f32 %v1057_v5, %v59_v7 }
  0x12   :  { %v61_v9 = vadd.f32 %v1057_v5, %v60_v8 }
  0x14   :  { %v1233_v10 = vsel %vm62_vm1, %v1057_v5, %v61_v9 }
  0x76   :  { %v53_v11 = vpop.xlane.xlu0 %52 }
  0x77   :  { %v64_v12 = vmul.f32 %v1233_v10, %v53_v11 }
  0x79   :  { %v66_v13 = vsub.f32 %v1222_v0, %v64_v12 }
  0x7b   :  { %v68_v14 = vmul.f32 %v66_v13, %v66_v13 }
  0x7d   :  { %v70_v15 = vsel %vm50_vm0, %v68_v14, 0.0 }
  0x7e   :  { %71 = vadd.xlane.f32.xlu1 %v70_v15  ;;  %v56_v16 = vpop.xlane.xlu0 %55 }
  0x7f   :  { %v65_v17 = vmul.f32 %v1233_v10, %v56_v16 }
  0x81   :  { %v67_v18 = vsub.f32 %v1229_v2, %v65_v17 }
  0x83   :  { %v69_v19 = vmul.f32 %v67_v18, %v67_v18 }
  0x85   :  { %v73_v20 = vsel %vm50_vm0, %v69_v19, 0.0 }
  0x86   :  { %74 = vadd.xlane.f32.xlu1 %v73_v20 }
  0xf1   :  { %v72_v22 = vpop.xlane.xlu1 %71 }
  0xf2   :  { %v76_v24 = vmul.f32 %v72_v22, %v1233_v10 }
  0xf4   :  { %v78_v25 = vadd.f32 1e-05, %v76_v24 }
  0xf6   :  { %1058 = vrsqrt.f32 %v78_v25  ;;  %vm86_vm3 = vweird.f32 %v78_v25 }
  0xf9   :  { %v75_v26 = vpop.xlane.xlu1 %74 }
  0xfa   :  { %v77_v27 = vmul.f32 %v75_v26, %v1233_v10 }
  0xfc   :  { %v1059_v28 = vpop.eup %1058  ;;  %v79_v29 = vadd.f32 1e-05, %v77_v27 }
  0xfd   :  { %v81_v30 = vmul.f32 %v1059_v28, %v78_v25  ;;  %vm87_vm2 = vweird.f32 %v1059_v28 }
  0xfe   :  { %1060 = vrsqrt.f32 %v79_v29  ;;  %vm88_vm4 = vmor %vm86_vm3, %vm87_vm2  ;;  %vm96_vm6 = vweird.f32 %v79_v29 }
  0xff   :  { %v82_v31 = vmul.f32 %v1059_v28, %v81_v30 }
 0x101   :  { %v83_v32 = vmul.f32 0.5, %v82_v31 }
 0x103   :  { %v84_v33 = vsub.f32 1.5, %v83_v32 }
 0x104   :  { %v1061_v34 = vpop.eup %1060 }
 0x105   :  { %v85_v35 = vmul.f32 %v1059_v28, %v84_v33  ;;  %v91_v36 = vmul.f32 %v1061_v34, %v79_v29  ;;  %vm97_vm5 = vweird.f32 %v1061_v34 }
 0x106   :  { %vm98_vm7 = vmor %vm96_vm6, %vm97_vm5 }
 0x107   :  { %v92_v37 = vmul.f32 %v1061_v34, %v91_v36  ;;  %v89_v38 = vsel %vm88_vm4, %v1059_v28, %v85_v35 }
 0x108   :  { %v100_v41 = vmul.f32 %v89_v38, %v66_v13 }
 0x109   :  { %v93_v39 = vmul.f32 0.5, %v92_v37 }
 0x10a   :  { %v105_v46 = vmul.f32 %v1048_v42, %v100_v41 }
 0x10b   :  { %v94_v40 = vsub.f32 1.5, %v93_v39 }
 0x10c   :  { %v110_v49 = vadd.f32 %v1049_v47, %v105_v46 }
 0x10d   :  { %v95_v43 = vmul.f32 %v1061_v34, %v94_v40 }
 0x10f   :  { %v99_v44 = vsel %vm98_vm7, %v1061_v34, %v95_v43 }
 0x110   :  { %v101_v45 = vmul.f32 %v99_v44, %v67_v18 }
 0x112   :  { %v106_v48 = vmul.f32 %v1048_v42, %v101_v45 }
 0x114   :  { %v111_v50 = vadd.f32 %v1049_v47, %v106_v48 }
 0x116   :  { %v112_v51 = vpack.c.bf16 %v111_v50, %v110_v49 }
 0x118   :  { %943 = vmatmul.msk.bf16.vlgmr.msra.gmra.mxu0 %vm50_vm0, %v112_v51 }
 0x195   :  { %v145_v53 = vpop.f32.mrf.mxu0 }
 0x196   :  { %v146_v54 = vadd.f32 %v1050_v52, %v145_v53 }
 0x198   :  { %v150_v55 = vpack.c.bf16 %v146_v54, %v146_v54 }
 0x19a   :  { %v153_v56 = vunpack.c.l.b16 %v150_v55 }
 0x19c   :  { %v1259_v57 = vpack.c.b16 %v153_v56, %v153_v56 }
 0x19d   :  { %v147_v58 = vpop.f32.mrf.mxu0 }
 0x19e   :  { %v148_v59 = vadd.f32 %v1050_v52, %v147_v58  ;;  %273 = vrot.lane.b32.xlu1 %v1259_v57, %s1133_s5  ;;  %275 = vrot.lane.b32.xlu0 %v1259_v57, %s1134_s6 }
 0x19f   :  { %155 = vrot.lane.b32.xlu2 %v1259_v57, %s1135_s20 }
 0x1a0   :  { %v151_v60 = vpack.c.bf16 %v148_v59, %v148_v59 }
 0x1a2   :  { %v178_v61 = vunpack.c.l.b16 %v151_v60 }
 0x1a4   :  { %v1264_v62 = vpack.c.b16 %v178_v61, %v178_v61 }
 0x1a6   :  { %421 = vrot.lane.b32.xlu1 %v1264_v62, %s1136_s2  ;;  %423 = vrot.lane.b32.xlu0 %v1264_v62, %s1137_s21 }
 0x1a7   :  { %180 = vrot.lane.b32.xlu2 %v1264_v62, %s1135_s20 }
 0x1ae   :  { %523 = vrot.lane.b32.xlu1 %v1259_v57, %s1138_s22  ;;  %525 = vrot.lane.b32.xlu0 %v1259_v57, %s1139_s23 }
 0x1af   :  { %298 = vrot.lane.b32.xlu2 %v1264_v62, %s1134_s6 }
 0x1b6   :  { %546 = vrot.lane.b32.xlu0 %v1264_v62, %s1138_s22 }
 0x1b7   :  { %296 = vrot.lane.b32.xlu2 %v1264_v62, %s1133_s5 }
 0x1be   :  { %225 = vrot.lane.b32.xlu0 %v1259_v57, %s1140_s24 }
 0x1bf   :  { %400 = vrot.lane.b32.xlu2 %v1259_v57, %s1137_s21 }
 0x1c7   :  { %398 = vrot.lane.b32.xlu2 %v1259_v57, %s1136_s2 }
 0x1cf   :  { %548 = vrot.lane.b32.xlu2 %v1264_v62, %s1139_s23 }
 0x1f9   :  { %v156_v63 = vpop.permute.xlu2 %155 }
 0x1fa   :  { %v162_v1 = vsel %vm157_vm8, %v156_v63, 0 }
 0x1fb   :  { %171 = vmatpush.bf16.xpose.msra.mxu1 %v162_v1 }
 0x201   :  { %v181_v3 = vpop.permute.xlu2 %180 }
 0x202   :  { %944 = vmatmul.msk.bf16.vlgmr.msra.gmra.mxu1 %vm157_vm8, %v150_v55  ;;  %v186_v4 = vsel %vm157_vm8, %v181_v3, 0 }
 0x203   :  { %195 = vmatpush.bf16.xpose.msra.mxu2 %v186_v4 }
 0x209   :  { %v299_v5 = vpop.permute.xlu2 %298 }
 0x20a   :  { %945 = vmatmul.msk.bf16.vlgmr.msra.gmra.mxu2 %vm157_vm8, %v151_v60  ;;  %v304_v6 = vsel %vm157_vm8, %v299_v5, 0 }
 0x20b   :  { %313 = vmatpush.bf16.xpose.msrb.mxu1 %v304_v6 }
 0x210   :  { %v276_v7 = vpop.permute.xlu0 %275  ;;  %v274_v11 = vpop.permute.xlu1 %273 }
 0x211   :  { %v297_v8 = vpop.permute.xlu2 %296  ;;  %v281_v9 = vsel %vm157_vm8, %v276_v7, 0 }
 0x212   :  { %949 = vmatmul.msk.bf16.vlgmr.msrb.gmra.mxu1 %vm157_vm8, %v297_v8  ;;  %290 = vmatpush.bf16.xpose.msrb.mxu0 %v281_v9 }
 0x218   :  { %v424_v12 = vpop.permute.xlu0 %423  ;;  %v422_v17 = vpop.permute.xlu1 %421 }
 0x219   :  { %v429_v13 = vsel %vm157_vm8, %v424_v12, 0  ;;  %v401_v14 = vpop.permute.xlu2 %400  ;;  %948 = vmatmul.msk.bf16.vlgmr.msrb.gmra.mxu0 %vm157_vm8, %v274_v11 }
 0x21a   :  { %v406_v15 = vsel %vm157_vm8, %v401_v14, 0  ;;  %438 = vmatpush.bf16.xpose.msra.mxu1 %v429_v13 }
 0x21b   :  { %415 = vmatpush.bf16.xpose.msra.mxu0 %v406_v15 }
 0x220   :  { %v526_v16 = vpop.permute.xlu0 %525  ;;  %v524_v25 = vpop.permute.xlu1 %523 }
 0x221   :  { %v531_v18 = vsel %vm157_vm8, %v526_v16, 0  ;;  %v399_v19 = vpop.permute.xlu2 %398 }
 0x222   :  { %953 = vmatmul.msk.bf16.vlgmr.msra.gmra.mxu1 %vm157_vm8, %v422_v17 }
 0x223   :  { %540 = vmatpush.bf16.xpose.msrb.mxu0 %v531_v18 }
 0x228   :  { %v547_v20 = vpop.permute.xlu0 %546 }
 0x229   :  { %v549_v21 = vpop.permute.xlu2 %548  ;;  %952 = vmatmul.msk.bf16.vlgmr.msra.gmra.mxu0 %vm157_vm8, %v399_v19 }
 0x22a   :  { %v554_v22 = vsel %vm157_vm8, %v549_v21, 0 }
 0x22b   :  { %563 = vmatpush.bf16.xpose.msrb.mxu1 %v554_v22 }
 0x230   :  { %v226_v23 = vpop.permute.xlu0 %225 }
 0x231   :  { %v232_v24 = vsel %vm230_vm9, %v226_v23, 0 }
 0x232   :  { %957 = vmatmul.msk.bf16.vlgmr.msrb.gmra.mxu1 %vm157_vm8, %v547_v20  ;;  %241 = vmatpush.bf16.msra.mxu3 %v232_v24 }
 0x239   :  { %956 = vmatmul.msk.bf16.vlgmr.msrb.gmra.mxu0 %vm157_vm8, %v524_v25 }
 0x27f   :  { %v173_v26 = vpop.f32.mrf.mxu1 }
 0x280   :  { %v201_v27 = vsel %vm157_vm8, %v173_v26, -inf }
 0x281   :  { %202 = vmax.xlane.f32.xlu2 %v201_v27 }
 0x287   :  { %v175_v28 = vpop.f32.mrf.mxu1 }
 0x28d   :  { %v197_v29 = vpop.f32.mrf.mxu2 }
 0x28e   :  { %v204_v30 = vsel %vm157_vm8, %v197_v29, -inf }
 0x28f   :  { %205 = vmax.xlane.f32.xlu1 %v204_v30  ;;  %v1298_v31 = vpop.f32.mrf.mxu1 }
 0x290   :  { %v322_v32 = vsel %vm157_vm8, %v1298_v31, -inf }
 0x291   :  { %323 = vmax.xlane.f32.xlu2 %v322_v32 }
 0x295   :  { %v199_v33 = vpop.f32.mrf.mxu2 }
 0x296   :  { %v292_v34 = vpop.f32.mrf.mxu0 }
 0x297   :  { %v317_v35 = vpop.f32.mrf.mxu1  ;;  %v319_v36 = vsel %vm157_vm8, %v292_v34, -inf }
 0x298   :  { %320 = vmax.xlane.f32.xlu0 %v319_v36 }
 0x29e   :  { %v294_v37 = vpop.f32.mrf.mxu0 }
 0x29f   :  { %v1303_v38 = vpop.f32.mrf.mxu1 }
 0x2a0   :  { %v447_v39 = vsel %vm157_vm8, %v1303_v38, -inf }
 0x2a1   :  { %448 = vmax.xlane.f32.xlu1 %v447_v39 }
 0x2a6   :  { %v417_v40 = vpop.f32.mrf.mxu0 }
 0x2a7   :  { %v442_v41 = vpop.f32.mrf.mxu1  ;;  %v444_v42 = vsel %vm157_vm8, %v417_v40, -inf }
 0x2a8   :  { %445 = vmax.xlane.f32.xlu2 %v444_v42 }
 0x2ae   :  { %v419_v43 = vpop.f32.mrf.mxu0 }
 0x2af   :  { %v1308_v44 = vpop.f32.mrf.mxu1 }
 0x2b0   :  { %v572_v45 = vsel %vm157_vm8, %v1308_v44, -inf }
 0x2b1   :  { %573 = vmax.xlane.f32.xlu0 %v572_v45 }
 0x2b6   :  { %v542_v46 = vpop.f32.mrf.mxu0 }
 0x2b7   :  { %v567_v47 = vpop.f32.mrf.mxu1  ;;  %v569_v48 = vsel %vm157_vm8, %v542_v46, -inf }
 0x2b8   :  { %570 = vmax.xlane.f32.xlu2 %v569_v48 }
 0x2be   :  { %v544_v49 = vpop.f32.mrf.mxu0 }
 0x2c5   :  { %468 = vrot.lane.b32.xlu0 %v1259_v57, %s1141_s25 }
 0x2d0   :  { %343 = vrot.lane.b32.xlu2 %v1259_v57, %s1142_s26 }
 0x2f4   :  { %v203_v50 = vpop.xlane.xlu2 %202 }
 0x2f5   :  { %v207_v51 = vsub.f32 %v173_v26, %v203_v50 }
 0x2f7   :  { %v209_v52 = vmul.f32 1.442695, %v207_v51 }
 0x2f9   :  { %1062 = vpow2.f32 %v209_v52 }
 0x2ff   :  { %v1063_v53 = vpop.eup %1062 }
 0x300   :  { %v213_v54 = vsel %vm157_vm8, %v1063_v53, 0.0 }
 0x301   :  { %214 = vadd.xlane.f32.xlu1 %v213_v54 }
 0x302   :  { %v206_v55 = vpop.xlane.xlu1 %205 }
 0x303   :  { %v208_v59 = vsub.f32 %v197_v29, %v206_v55 }
 0x304   :  { %v324_v63 = vpop.xlane.xlu2 %323 }
 0x305   :  { %v211_v61 = vmul.f32 1.442695, %v208_v59  ;;  %v326_v16 = vsub.f32 %v1298_v31, %v324_v63 }
 0x307   :  { %v329_v18 = vmul.f32 1.442695, %v326_v16 }
 0x30b   :  { %v321_v56 = vpop.xlane.xlu0 %320 }
 0x30c   :  { %v325_v58 = vsub.f32 %v292_v34, %v321_v56 }
 0x30e   :  { %v327_v60 = vmul.f32 1.442695, %v325_v58 }
 0x310   :  { %1064 = vpow2.f32 %v327_v60 }
 0x311   :  { %1066 = vpow2.f32 %v211_v61 }
 0x314   :  { %v449_v24 = vpop.xlane.xlu1 %448 }
 0x315   :  { %v451_v25 = vsub.f32 %v1303_v38, %v449_v24 }
 0x316   :  { %v1318_v1 = vpop.eup %1064 }
 0x317   :  { %v331_v3 = vsel %vm157_vm8, %v1318_v1, 0.0  ;;  %v1067_v5 = vpop.eup %1066  ;;  %v454_v26 = vmul.f32 1.442695, %v451_v25 }
 0x318   :  { %332 = vadd.xlane.f32.xlu2 %v331_v3  ;;  %v216_v8 = vsel %vm157_vm8, %v1067_v5, 0.0 }
 0x31a   :  { %247 = vrot.lane.b32.xlu1 %v1264_v62, %s1140_s24 }
 0x31b   :  { %v446_v4 = vpop.xlane.xlu2 %445 }
 0x31c   :  { %v450_v6 = vsub.f32 %v417_v40, %v446_v4 }
 0x31e   :  { %v452_v7 = vmul.f32 1.442695, %v450_v6 }
 0x320   :  { %1068 = vpow2.f32 %v452_v7  ;;  %217 = vadd.xlane.f32.xlu2 %v216_v8 }
 0x324   :  { %v574_v15 = vpop.xlane.xlu0 %573 }
 0x325   :  { %v576_v30 = vsub.f32 %v1308_v44, %v574_v15 }
 0x326   :  { %v1325_v9 = vpop.eup %1068 }
 0x327   :  { %v456_v11 = vsel %vm157_vm8, %v1325_v9, 0.0  ;;  %v579_v31 = vmul.f32 1.442695, %v576_v30 }
 0x328   :  { %457 = vadd.xlane.f32.xlu0 %v456_v11 }
 0x32b   :  { %v571_v12 = vpop.xlane.xlu2 %570 }
 0x32c   :  { %v575_v13 = vsub.f32 %v542_v46, %v571_v12 }
 0x32e   :  { %v577_v14 = vmul.f32 1.442695, %v575_v13 }
 0x330   :  { %1070 = vpow2.f32 %v577_v14 }
 0x331   :  { %1072 = vpow2.f32 %v329_v18 }
 0x332   :  { %1074 = vpow2.f32 %v454_v26 }
 0x333   :  { %v344_v36 = vpop.permute.xlu2 %343 }
 0x334   :  { %v349_v40 = vsel %vm230_vm9, %v344_v36, 0 }
 0x336   :  { %v1330_v17 = vpop.eup %1070 }
 0x337   :  { %v469_v19 = vpop.permute.xlu0 %468  ;;  %v581_v20 = vsel %vm157_vm8, %v1330_v17, 0.0  ;;  %v1073_v22 = vpop.eup %1072 }
 0x338   :  { %364 = vrot.lane.b32.xlu2 %v1264_v62, %s1142_s26  ;;  %v474_v21 = vsel %vm230_vm9, %v469_v19, 0  ;;  %582 = vadd.xlane.f32.xlu0 %v581_v20  ;;  %v334_v23 = vsel %vm157_vm8, %v1073_v22, 0.0  ;;  %v1340_v27 = vpop.eup %1074 }
 0x339   :  { %483 = vmatpush.bf16.msrb.mxu2 %v474_v21  ;;  %v459_v28 = vsel %vm157_vm8, %v1340_v27, 0.0 }
 0x344   :  { %335 = vadd.xlane.f32.xlu1 %v334_v23 }
 0x34c   :  { %614 = vrot.lane.b32.xlu0 %v1264_v62, %s1143_s27 }
 0x35d   :  { %489 = vrot.lane.b32.xlu1 %v1264_v62, %s1141_s25 }
 0x361   :  { %460 = vadd.xlane.f32.xlu2 %v459_v28 }
 0x374   :  { %v215_v29 = vpop.xlane.xlu1 %214 }
 0x375   :  { %1076 = vrcp.f32 %v215_v29 }
 0x376   :  { %1078 = vpow2.f32 %v579_v31 }
 0x379   :  { %593 = vrot.lane.b32.xlu2 %v1259_v57, %s1143_s27 }
 0x37b   :  { %v1077_v32 = vpop.eup %1076 }
 0x37c   :  { %v221_v33 = vmul.f32 %v1077_v32, %v1063_v53  ;;  %v1079_v35 = vpop.eup %1078 }
 0x37d   :  { %v584_v62 = vsel %vm157_vm8, %v1079_v35, 0.0 }
 0x37e   :  { %v223_v34 = vpack.c.bf16 %v221_v33, %v221_v33 }
 0x380   :  { %946 = vmatmul.msk.bf16.vlgmr.msra.gmra.mxu3 %vm157_vm8, %v223_v34 }
 0x387   :  { %585 = vadd.xlane.f32.xlu1 %v584_v62 }
 0x38b   :  { %v333_v37 = vpop.xlane.xlu2 %332 }
 0x38c   :  { %v248_v38 = vpop.permute.xlu1 %247 }
 0x38d   :  { %v253_v39 = vsel %vm230_vm9, %v248_v38, 0 }
 0x38e   :  { %262 = vmatpush.bf16.msrb.mxu3 %v253_v39 }
 0x392   :  { %358 = vmatpush.bf16.msra.mxu3 %v349_v40 }
 0x393   :  { %v218_v57 = vpop.xlane.xlu2 %217 }
 0x394   :  { %1080 = vrcp.f32 %v218_v57 }
 0x39a   :  { %v1081_v41 = vpop.eup %1080 }
 0x39b   :  { %v222_v42 = vmul.f32 %v1081_v41, %v1067_v5  ;;  %v458_v43 = vpop.xlane.xlu0 %457  ;;  %v365_v44 = vpop.permute.xlu2 %364  ;;  %v1020_v41 = vld [vmem:[%s1451_s3 + $0x8] sm:$0xff] }
 0x39c   :  { %1082 = vrcp.f32 %v458_v43  ;;  %v370_v46 = vsel %vm230_vm9, %v365_v44, 0  ;;  %684 = vmatpush.bf16.msra.mxu0 %v1020_v41  ;;  %v1019_v43 = vld [vmem:[%s1451_s3] sm:$0xff]  ;;  %s1147_s3 = smov [#allocation3]  }
 0x39d   :  { %v224_v45 = vpack.c.bf16 %v222_v42, %v222_v42  ;;  %1084 = vrcp.f32 %v333_v37 }
 0x39f   :  { %947 = vmatmul.msk.bf16.vlgmr.msrb.gmra.mxu3 %vm157_vm8, %v224_v45 }
 0x3a0   :  { %379 = vmatpush.bf16.msrb.mxu3 %v370_v46  ;;  %685 = vmatpush.bf16.msra.mxu0 %v1019_v43  ;;  %v1024_v43 = vld [vmem:[%s1459_s11 + $0x8] sm:$0xff] }
 0x3a2   :  { %v1083_v47 = vpop.eup %1082 }
 0x3a3   :  { %v464_v48 = vmul.f32 %v1083_v47, %v1325_v9  ;;  %v1085_v50 = vpop.eup %1084  ;;  %v1051_v47 = vld [vmem:[%s1452_s4] ss:$0 sm:$0xff]  ;;  %s921_s4 = sshll.u32 %s1147_s3, 4  ;;  %s922_s4 = int_to_ptr.vmem [resolvable:$true] %s921_s4 }
 0x3a4   :  { %v339_v51 = vmul.f32 %v1085_v50, %v1318_v1 }
 0x3a5   :  { %v466_v49 = vpack.c.bf16 %v464_v48, %v464_v48 }
 0x3a6   :  { %v341_v52 = vpack.c.bf16 %v339_v51, %v339_v51 }
 0x3a7   :  { %954 = vmatmul.msk.bf16.vlgmr.msrb.gmra.mxu2 %vm157_vm8, %v466_v49 }
 0x3ab   :  { %v583_v58 = vpop.xlane.xlu0 %582 }
 0x3af   :  { %950 = vmatmul.msk.bf16.vlgmr.msra.gmra.mxu3 %vm157_vm8, %v341_v52 }
 0x3b7   :  { %v336_v53 = vpop.xlane.xlu1 %335 }
 0x3b8   :  { %1086 = vrcp.f32 %v336_v53 }
 0x3b9   :  { %1088 = vrcp.f32 %v583_v58 }
 0x3be   :  { %v1087_v54 = vpop.eup %1086  ;;  %v615_v59 = vpop.permute.xlu0 %614 }
 0x3bf   :  { %v340_v55 = vmul.f32 %v1087_v54, %v1073_v22  ;;  %v620_v63 = vsel %vm230_vm9, %v615_v59, 0  ;;  %v1089_v3 = vpop.eup %1088 }
 0x3c0   :  { %v589_v5 = vmul.f32 %v1089_v3, %v1330_v17 }
 0x3c1   :  { %v342_v56 = vpack.c.bf16 %v340_v55, %v340_v55 }
 0x3c2   :  { %v591_v11 = vpack.c.bf16 %v589_v5, %v589_v5 }
 0x3c3   :  { %951 = vmatmul.msk.bf16.vlgmr.msrb.gmra.mxu3 %vm157_vm8, %v342_v56 }
 0x3cf   :  { %v490_v60 = vpop.permute.xlu1 %489 }
 0x3d0   :  { %v495_v61 = vsel %vm230_vm9, %v490_v60, 0 }
 0x3d1   :  { %504 = vmatpush.bf16.msra.mxu3 %v495_v61 }
 0x3d4   :  { %v461_v1 = vpop.xlane.xlu2 %460 }
 0x3d5   :  { %629 = vmatpush.bf16.msrb.mxu3 %v620_v63  ;;  %1090 = vrcp.f32 %v461_v1 }
 0x3db   :  { %v1091_v4 = vpop.eup %1090 }
 0x3dc   :  { %v465_v6 = vmul.f32 %v1091_v4, %v1340_v27  ;;  %v594_v7 = vpop.permute.xlu2 %593  ;;  %v1022_v4 = vld [vmem:[%s1457_s9 + $0x8] sm:$0xff] }
 0x3dd   :  { %v599_v8 = vsel %vm230_vm9, %v594_v7, 0  ;;  %780 = vmatpush.bf16.msra.mxu1 %v1022_v4  ;;  %v1021_v7 = vld [vmem:[%s1457_s9] sm:$0xff]  ;;  %s923_s9 = sshll.u32 %s1461_s13, 4  ;;  %s924_s9 = int_to_ptr.hbm [resolvable:$true] %s923_s9 }
 0x3de   :  { %v467_v9 = vpack.c.bf16 %v465_v6, %v465_v6  ;;  %608 = vmatpush.bf16.msra.mxu2 %v599_v8 }
 0x3e0   :  { %955 = vmatmul.msk.bf16.vlgmr.msra.gmra.mxu3 %vm157_vm8, %v467_v9 }
 0x3e1   :  { %958 = vmatmul.msk.bf16.vlgmr.msra.gmra.mxu2 %vm157_vm8, %v591_v11  ;;  %781 = vmatpush.bf16.msra.mxu1 %v1021_v7 }
 0x3fa   :  { %v586_v12 = vpop.xlane.xlu1 %585 }
 0x3fb   :  { %1092 = vrcp.f32 %v586_v12 }
 0x401   :  { %v1093_v13 = vpop.eup %1092 }
 0x402   :  { %v590_v14 = vmul.f32 %v1093_v13, %v1079_v35 }
 0x403   :  { %v243_v15 = vpop.f32.mrf.mxu3 }
 0x404   :  { %v592_v16 = vpack.c.bf16 %v590_v14, %v590_v14  ;;  %v268_v17 = vpack.c.bf16 %v243_v15, %v243_v15 }
 0x406   :  { %271 = vst.msk [vmem:[#allocation2] sm:$0xf] %vm270_vm10, %v268_v17  ;;  %959 = vmatmul.msk.bf16.vlgmr.msrb.gmra.mxu3 %vm157_vm8, %v592_v16 }
 0x40b   :  { %v245_v18 = vpop.f32.mrf.mxu3 }
 0x422   :  { %v264_v19 = vpop.f32.mrf.mxu3 }
 0x423   :  { %v269_v20 = vpack.c.bf16 %v264_v19, %v264_v19 }
 0x425   :  { %272 = vst.msk [vmem:[#allocation2 + $0x4] sm:$0xf] %vm270_vm10, %v269_v20 }
 0x42a   :  { %v266_v21 = vpop.f32.mrf.mxu3  ;;  %v485_v22 = vpop.f32.mrf.mxu2 }
 0x42b   :  { %v510_v23 = vpack.c.bf16 %v485_v22, %v485_v22 }
 0x42d   :  { %514 = vrot.lane.b32.xlu1 %v510_v23, %s1144_s28 }
 0x432   :  { %v360_v24 = vpop.f32.mrf.mxu3  ;;  %v487_v25 = vpop.f32.mrf.mxu2 }
 0x433   :  { %v385_v26 = vpack.c.bf16 %v360_v24, %v360_v24 }
 0x435   :  { %389 = vrot.lane.b32.xlu2 %v385_v26, %s1145_s0 }
 0x43a   :  { %v362_v27 = vpop.f32.mrf.mxu3 }
 0x446   :  { %v381_v28 = vpop.f32.mrf.mxu3 }
 0x447   :  { %v386_v29 = vpack.c.bf16 %v381_v28, %v381_v28  ;;  %v1053_v28 = vld [vmem:[%s1456_s8] ss:$0 sm:$0xff] }
 0x449   :  { %391 = vrot.lane.b32.xlu2 %v386_v29, %s1145_s0 }
 0x44e   :  { %v383_v30 = vpop.f32.mrf.mxu3 }
 0x463   :  { %v506_v31 = vpop.f32.mrf.mxu3 }
 0x464   :  { %v511_v32 = vpack.c.bf16 %v506_v31, %v506_v31  ;;  %v610_v33 = vpop.f32.mrf.mxu2 }
 0x465   :  { %v635_v34 = vpack.c.bf16 %v610_v33, %v610_v33 }
 0x466   :  { %516 = vrot.lane.b32.xlu2 %v511_v32, %s1144_s28 }
 0x467   :  { %639 = vrot.lane.b32.xlu0 %v635_v34, %s1146_s29 }
 0x46b   :  { %v508_v35 = vpop.f32.mrf.mxu3 }
 0x46c   :  { %v612_v36 = vpop.f32.mrf.mxu2  ;;  %v1030_v35 = vld [vmem:[%s1459_s11 + $0x38] sm:$0xff] }
 0x46d   :  { %899 = vmatpush.bf16.msrb.mxu2 %v1030_v35  ;;  %v1029_v36 = vld [vmem:[%s1459_s11 + $0x30] sm:$0xff] }
 0x471   :  { %900 = vmatpush.bf16.msrb.mxu2 %v1029_v36 }
 0x489   :  { %v631_v62 = vpop.f32.mrf.mxu3 }
 0x48a   :  { %v636_v37 = vpack.c.bf16 %v631_v62, %v631_v62  ;;  %v1028_v62 = vld [vmem:[%s1459_s11 + $0x28] sm:$0xff] }
 0x48b   :  { %901 = vmatpush.bf16.msrb.mxu2 %v1028_v62 }
 0x48c   :  { %641 = vrot.lane.b32.xlu2 %v636_v37, %s1146_s29  ;;  %v1027_v37 = vld [vmem:[%s1459_s11 + $0x20] sm:$0xff] }
 0x48f   :  { %v390_v38 = vpop.permute.xlu2 %389  ;;  %902 = vmatpush.bf16.msrb.mxu2 %v1027_v37 }
 0x490   :  { %396 = vst.msk [vmem:[#allocation2] sm:$0xf] %vm395_vm11, %v390_v38  ;;  %v1026_v38 = vld [vmem:[%s1459_s11 + $0x18] sm:$0xff] }
 0x491   :  { %v633_v39 = vpop.f32.mrf.mxu3 }
 0x492   :  { %v1054_v39 = vld [vmem:[%s1458_s10] ss:$0 sm:$0xff] }
 0x493   :  { %903 = vmatpush.bf16.msrb.mxu2 %v1026_v38 }
 0x49f   :  { %v515_v40 = vpop.permute.xlu1 %514 }
 0x4a0   :  { %521 = vst.msk [vmem:[#allocation2] sm:$0xf] %vm520_vm12, %v515_v40 }
 0x4a3   :  { %v392_v57 = vpop.permute.xlu2 %391 }
 0x4a4   :  { %397 = vst.msk [vmem:[#allocation2 + $0x4] sm:$0xf] %vm395_vm11, %v392_v57  ;;  %v1025_v57 = vld [vmem:[%s1459_s11 + $0x10] sm:$0xff] }
 0x4a5   :  { %904 = vmatpush.bf16.msrb.mxu2 %v1025_v57 }
 0x4a9   :  { %905 = vmatpush.bf16.msrb.mxu2 %v1024_v43 }
 0x4c0   :  { %v517_v42 = vpop.permute.xlu2 %516 }
 0x4c1   :  { %522 = vst.msk [vmem:[#allocation2 + $0x4] sm:$0xf] %vm520_vm12, %v517_v42 }
 0x4d9   :  { %v640_v44 = vpop.permute.xlu0 %639 }
 0x4da   :  { %646 = vst.msk [vmem:[#allocation2] sm:$0xf] %vm645_vm13, %v640_v44 }
 0x4e6   :  { %v642_v45 = vpop.permute.xlu2 %641 }
 0x4e7   :  { %647 = vst.msk [vmem:[#allocation2 + $0x4] sm:$0xf] %vm645_vm13, %v642_v45 }
 0x4ee   :  { %v1018_v46 = vld [vmem:[#allocation2] sm:$0xff] }
 0x4ef   :  { %972 = vmatmul.msk.bf16.vlgmr.msra.gmra.mxu0 %vm50_vm0, %v1018_v46  ;;  %v1023_v46 = vld [vmem:[%s1459_s11] sm:$0xff] }
 0x4f0   :  { %906 = vmatpush.bf16.msrb.mxu2 %v1023_v46 }
 0x56c   :  { %v687_v48 = vpop.f32.mrf.mxu0 }
 0x56d   :  { %v688_v49 = vadd.f32 %v1051_v47, %v687_v48 }
 0x56f   :  { %v1380_v50 = vadd.f32 %v688_v49, %v1222_v0 }
 0x571   :  { %v696_v51 = vsel %vm50_vm0, %v1380_v50, 0.0 }
 0x572   :  { %697 = vadd.xlane.f32.xlu0 %v696_v51 }
 0x574   :  { %v689_v52 = vpop.f32.mrf.mxu0 }
 0x575   :  { %v690_v53 = vadd.f32 %v1051_v47, %v689_v52 }
 0x577   :  { %v1385_v54 = vadd.f32 %v690_v53, %v1229_v2 }
 0x579   :  { %v699_v55 = vsel %vm50_vm0, %v1385_v54, 0.0 }
 0x57a   :  { %700 = vadd.xlane.f32.xlu2 %v699_v55 }
 0x5e5   :  { %v698_v56 = vpop.xlane.xlu0 %697 }
 0x5e6   :  { %v702_v58 = vmul.f32 %v698_v56, %v1233_v10 }
 0x5e8   :  { %v704_v59 = vsub.f32 %v1380_v50, %v702_v58 }
 0x5ea   :  { %v706_v0 = vmul.f32 %v704_v59, %v704_v59 }
 0x5ec   :  { %v708_v60 = vsel %vm50_vm0, %v706_v0, 0.0 }
 0x5ed   :  { %v701_v61 = vpop.xlane.xlu2 %700  ;;  %709 = vadd.xlane.f32.xlu1 %v708_v60 }
 0x5ee   :  { %v703_v63 = vmul.f32 %v701_v61, %v1233_v10 }
 0x5f0   :  { %v705_v1 = vsub.f32 %v1385_v54, %v703_v63 }
 0x5f2   :  { %v707_v2 = vmul.f32 %v705_v1, %v705_v1 }
 0x5f4   :  { %v711_v3 = vsel %vm50_vm0, %v707_v2, 0.0 }
 0x5f5   :  { %712 = vadd.xlane.f32.xlu0 %v711_v3 }
 0x660   :  { %v710_v5 = vpop.xlane.xlu1 %709 }
 0x661   :  { %v714_v6 = vmul.f32 %v710_v5, %v1233_v10 }
 0x663   :  { %v716_v8 = vadd.f32 1e-05, %v714_v6 }
 0x665   :  { %1094 = vrsqrt.f32 %v716_v8  ;;  %vm724_vm15 = vweird.f32 %v716_v8 }
 0x668   :  { %v713_v9 = vpop.xlane.xlu0 %712 }
 0x669   :  { %v715_v11 = vmul.f32 %v713_v9, %v1233_v10  ;;  %v1052_v10 = vld [vmem:[%s1455_s7] ss:$0 sm:$0xff] }
 0x66b   :  { %v1095_v12 = vpop.eup %1094  ;;  %v717_v13 = vadd.f32 1e-05, %v715_v11 }
 0x66c   :  { %v719_v14 = vmul.f32 %v1095_v12, %v716_v8  ;;  %vm725_vm14 = vweird.f32 %v1095_v12 }
 0x66d   :  { %1096 = vrsqrt.f32 %v717_v13  ;;  %vm726_vm1 = vmor %vm724_vm15, %vm725_vm14  ;;  %vm734_vm3 = vweird.f32 %v717_v13 }
 0x66e   :  { %v720_v15 = vmul.f32 %v1095_v12, %v719_v14 }
 0x670   :  { %v721_v16 = vmul.f32 0.5, %v720_v15 }
 0x672   :  { %v722_v17 = vsub.f32 1.5, %v721_v16 }
 0x673   :  { %v1097_v18 = vpop.eup %1096 }
 0x674   :  { %v723_v19 = vmul.f32 %v1095_v12, %v722_v17  ;;  %v729_v20 = vmul.f32 %v1097_v18, %v717_v13  ;;  %vm735_vm2 = vweird.f32 %v1097_v18 }
 0x675   :  { %vm736_vm4 = vmor %vm734_vm3, %vm735_vm2 }
 0x676   :  { %v730_v21 = vmul.f32 %v1097_v18, %v729_v20  ;;  %v727_v22 = vsel %vm726_vm1, %v1095_v12, %v723_v19 }
 0x677   :  { %v738_v25 = vmul.f32 %v727_v22, %v704_v59 }
 0x678   :  { %v731_v23 = vmul.f32 0.5, %v730_v21 }
 0x679   :  { %v743_v29 = vmul.f32 %v1052_v10, %v738_v25 }
 0x67a   :  { %v732_v24 = vsub.f32 1.5, %v731_v23 }
 0x67b   :  { %v748_v32 = vadd.f32 %v1053_v28, %v743_v29 }
 0x67c   :  { %v733_v26 = vmul.f32 %v1097_v18, %v732_v24 }
 0x67e   :  { %v737_v27 = vsel %vm736_vm4, %v1097_v18, %v733_v26  ;;  %v1055_v18 = vld [vmem:[%s1460_s12] ss:$0 sm:$0xff]  ;;  %s1148_s12 = smov 128  }
 0x67f   :  { %v739_v30 = vmul.f32 %v737_v27, %v705_v1 }
 0x681   :  { %v744_v31 = vmul.f32 %v1052_v10, %v739_v30 }
 0x683   :  { %v749_v33 = vadd.f32 %v1053_v28, %v744_v31 }
 0x685   :  { %v750_v34 = vpack.c.bf16 %v749_v33, %v748_v32 }
 0x687   :  { %981 = vmatmul.msk.bf16.vlgmr.msra.gmra.mxu1 %vm50_vm0, %v750_v34 }
 0x704   :  { %v783_v40 = vpop.f32.mrf.mxu1 }
 0x705   :  { %v784_v41 = vadd.f32 %v1054_v39, %v783_v40 }
 0x707   :  { %v982_v42 = vmul.f32 -1.702, %v784_v41 }
 0x709   :  { %v792_v44 = vmul.f32 1.442695, %v982_v42 }
 0x70b   :  { %1098 = vpow2.f32 %v792_v44 }
 0x70c   :  { %v785_v45 = vpop.f32.mrf.mxu1 }
 0x70d   :  { %v786_v47 = vadd.f32 %v1054_v39, %v785_v45 }
 0x70f   :  { %v983_v48 = vmul.f32 -1.702, %v786_v47 }
 0x711   :  { %v1099_v49 = vpop.eup %1098  ;;  %v794_v51 = vmul.f32 1.442695, %v983_v48 }
 0x712   :  { %v796_v52 = vadd.f32 1.0, %v1099_v49 }
 0x713   :  { %1100 = vpow2.f32 %v794_v51 }
 0x714   :  { %1102 = vrcp.f32 %v796_v52  ;;  %v809_v1 = vand.u32 2147483648, %v796_v52  ;;  %vm803_vm6 = vweird.f32 %v796_v52  ;;  %v807_v2 = vand.u32 2147483647, %v796_v52 }
 0x716   :  { %v810_v8 = vor.u32 1.1754944e-38, %v809_v1  ;;  %vm808_vm9 = vcmp.eq.f32.partialorder %v807_v2, 8.507059e+37 }
 0x719   :  { %v1101_v53 = vpop.eup %1100 }
 0x71a   :  { %v1103_v55 = vpop.eup %1102  ;;  %v797_v56 = vadd.f32 1.0, %v1101_v53 }
 0x71b   :  { %v799_v58 = vmul.f32 %v1103_v55, %v796_v52  ;;  %vm804_vm5 = vweird.f32 %v1103_v55 }
 0x71c   :  { %1104 = vrcp.f32 %v797_v56  ;;  %vm805_vm7 = vmor %vm803_vm6, %vm804_vm5  ;;  %v824_v4 = vand.u32 2147483648, %v797_v56  ;;  %v822_v7 = vand.u32 2147483647, %v797_v56  ;;  %vm818_vm10 = vweird.f32 %v797_v56 }
 0x71d   :  { %v800_v59 = vsub.f32 1.0, %v799_v58 }
 0x71e   :  { %v825_v12 = vor.u32 1.1754944e-38, %v824_v4  ;;  %vm823_vm12 = vcmp.eq.f32.partialorder %v822_v7, 8.507059e+37 }
 0x71f   :  { %v801_v0 = vmul.f32 %v1103_v55, %v800_v59 }
 0x721   :  { %v802_v61 = vadd.f32 %v1103_v55, %v801_v0 }
 0x722   :  { %v1105_v60 = vpop.eup %1104 }
 0x723   :  { %v814_v63 = vmul.f32 %v1105_v60, %v797_v56  ;;  %v806_v5 = vsel %vm805_vm7, %v1103_v55, %v802_v61  ;;  %vm819_vm8 = vweird.f32 %v1105_v60 }
 0x724   :  { %v811_v11 = vsel %vm808_vm9, %v810_v8, %v806_v5  ;;  %vm820_vm11 = vmor %vm818_vm10, %vm819_vm8 }
 0x725   :  { %v815_v3 = vsub.f32 1.0, %v814_v63  ;;  %v828_v15 = vmul.f32 %v811_v11, %v784_v41 }
 0x727   :  { %v816_v6 = vmul.f32 %v1105_v60, %v815_v3 }
 0x729   :  { %v817_v9 = vadd.f32 %v1105_v60, %v816_v6 }
 0x72b   :  { %v821_v13 = vsel %vm820_vm11, %v1105_v60, %v817_v9 }
 0x72c   :  { %v826_v14 = vsel %vm823_vm12, %v825_v12, %v821_v13 }
 0x72d   :  { %v829_v16 = vmul.f32 %v826_v14, %v786_v47 }
 0x72f   :  { %v830_v17 = vpack.c.bf16 %v829_v16, %v828_v15 }
 0x731   :  { %907 = vmatmul.bf16.vlgmr.msrb.gmra.mxu2 %v830_v17 }
 0x7b4   :  { %v908_v19 = vpop.f32.mrf.mxu2 }
 0x7b5   :  { %v909_v20 = vadd.f32 %v1055_v18, %v908_v19 }
 0x7b7   :  { %v913_v21 = vadd.f32 %v909_v20, %v1380_v50 }
 0x7b9   :  { %915 = vst.msk [vmem:[#allocation3] sm:$0xff] %vm50_vm0, %v913_v21 }
 0x7bc   :  { %v910_v22 = vpop.f32.mrf.mxu2 }
 0x7bd   :  { %v911_v23 = vadd.f32 %v1055_v18, %v910_v22 }
 0x7bf   :  { %v914_v24 = vadd.f32 %v911_v23, %v1385_v54 }
 0x7c1   :  { %916 = vst.msk [vmem:[#allocation3 + $0x8] sm:$0xff] %vm50_vm0, %v914_v24 }
 0x7c2   :  { %929 = dma.vmem_to_hbm [thread:$0]  %s922_s4, 256, %s924_s9, [#allocation4], %s1148_s12, %s1148_s12, %s1145_s0  }
 0x7c3   :  { %1130 = dma.done.wait [#allocation4], 256  }
 0x7c4   :  { %1131 = vsyncadd [#allocation4], 4294967040 }
 0x7c5   :  { %934 = vsyncpa [#allocation4], 1 }

</bundles_post_ra>
